<compile_context>
chip_gen: v5e
topology: v5e:2x2
jax: 0.10.0
libtpu: 0.0.40
codegen_flags: <defaults>
</compile_context>

<pallas_src>
import math

import numpy as np
import jax
import jax.numpy as jnp
from jax.experimental import pallas as pl
from jax.experimental.pallas import tpu as pltpu

_LANES = 128


def _round_up(a, m):
    return ((a + m - 1) // m) * m


# ----------------------------------------------------------------------------
# Fused kernel: per-sample metric + MC integration over K.
#   rows of a tile = G groups x K samples (whole groups, so the K-mean is local)
#   logits     = x_tile @ W + b                (MXU, bf16 inputs, f32 accumulate)
#   row_norm   = sum(logits^2, axis=-1)        (f32, lane reduce on the XLU)
#   out[g]     = sel @ row_norm                (tiny precomputed selection matmul
#                                               = mean over K; no relayout)
# ----------------------------------------------------------------------------
def _metric_kernel(x_ref, w_ref, b_ref, sel_ref, out_ref):
    # x_ref: (G*K, Dp)  w_ref: (Dp, Cp)  b_ref: (1, Cp) f32
    # sel_ref: (G, G*K) f32 (entries 1/K on the group's rows, else 0)
    # out_ref: (1, G, 128) f32
    logits = jnp.dot(x_ref[...], w_ref[...], preferred_element_type=jnp.float32)
    logits = logits + b_ref[...]                                   # f32 epilogue
    row_norm = jnp.sum(logits * logits, axis=-1, keepdims=True)    # (G*K, 1) f32

    # Grouped mean over K consecutive rows via the precomputed selection matmul;
    # avoids sublane<->lane relayout reshapes inside the kernel.
    group_mean = jnp.dot(sel_ref[...], row_norm,
                         preferred_element_type=jnp.float32)        # (G, 1)

    # Lane-dense store: broadcast each group value across the 128 lanes.
    out_ref[...] = jnp.broadcast_to(group_mean[None, :, :], out_ref.shape)


def metric_forward(x, w, b, *, target_tile_rows=512, use_bf16=True,
                   vmem_budget_bytes=24 * 1024 * 1024):
    """Metric.forward for the nbatch_dims == 2 case.

    x: (N, K, C, H, W); w: (D, C_out); b: (C_out,).  Returns (N,) f32.
    """
    n, k = int(x.shape[0]), int(x.shape[1])
    d = int(np.prod(x.shape[2:]))
    c_out = int(w.shape[1])

    compute_dtype = jnp.bfloat16 if use_bf16 else jnp.float32
    bytes_per_el = 2 if use_bf16 else 4
    sub = 16 if use_bf16 else 8

    d_pad = _round_up(d, _LANES)
    c_pad = _round_up(c_out, _LANES)

    # G = number of base points (groups of K samples) per grid step.  G*K must be
    # a multiple of the sublane granularity so the x tile is fully aligned.
    g_align = sub // math.gcd(k, sub)
    g = max(g_align, (target_tile_rows // k) // g_align * g_align)
    g = min(g, _round_up(n, g_align))
    # Keep (double-buffered x tile + resident W) under the VMEM budget (v7x: 64 MiB/TC).
    while g > g_align and (2 * g * k * d_pad * bytes_per_el
                           + d_pad * c_pad * bytes_per_el) > vmem_budget_bytes:
        g -= g_align
    # TODO(synk): for very large D (x row tile no longer fits VMEM) reintroduce a
    # D-reduction grid axis with a VMEM accumulator instead of a resident W.

    n_pad = _round_up(n, g)
    num_tiles = n_pad // g

    # Zero-padding is exact here: padded D columns of x hit zero rows of W,
    # padded output classes give zero logits (zero bias), padded N groups are dropped.
    x3 = jnp.asarray(x, jnp.float32).reshape(n, k, d)
    x3 = jnp.pad(x3, ((0, n_pad - n), (0, 0), (0, d_pad - d)))
    x_flat = x3.reshape(n_pad * k, d_pad).astype(compute_dtype)
    w_p = jnp.pad(jnp.asarray(w, jnp.float32), ((0, d_pad - d), (0, c_pad - c_out)))
    w_p = w_p.astype(compute_dtype)
    b_p = jnp.pad(jnp.asarray(b, jnp.float32), (0, c_pad - c_out)).reshape(1, c_pad)

    # Precomputed (G, G*K) selection matrix: block-diagonal rows of 1/K.
    # Built once on host (trace-time constant), resident in VMEM across the grid.
    sel_np = np.kron(np.eye(g, dtype=np.float32),
                     np.full((1, k), 1.0 / k, dtype=np.float32))
    sel = jnp.asarray(sel_np)

    out = pl.pallas_call(
        _metric_kernel,
        out_shape=jax.ShapeDtypeStruct((num_tiles, g, _LANES), jnp.float32),
        grid_spec=pltpu.PrefetchScalarGridSpec(
            num_scalar_prefetch=0,
            grid=(num_tiles,),
            in_specs=[
                pl.BlockSpec((g * k, d_pad), lambda i: (i, 0)),
                pl.BlockSpec((d_pad, c_pad), lambda i: (0, 0)),  # resident, no re-DMA
                pl.BlockSpec((1, c_pad), lambda i: (0, 0)),      # resident bias
                pl.BlockSpec((g, g * k), lambda i: (0, 0)),      # resident selection
            ],
            out_specs=pl.BlockSpec((1, g, _LANES), lambda i: (i, 0, 0)),
        ),
        compiler_params=pltpu.CompilerParams(
            dimension_semantics=("parallel",),
            vmem_limit_bytes=48 * 1024 * 1024,
        ),
    )(x_flat, w_p, b_p, sel)

    return out[:, :, 0].reshape(n_pad)[:n]


# ----------------------------------------------------------------------------
# Metric wrapper: mirrors Metric.__init__ shape bookkeeping + Metric.forward
# ----------------------------------------------------------------------------
class MetricPallas:
    def __init__(self, w, b, data_shape):
        assert len(data_shape) > 3, (
            "Error: expecting batches of shape (*, C, H, W), got: {}".format(
                tuple(data_shape)))
        self._data_shape = tuple(data_shape)
        self._batch_dims = self._data_shape[:-3]          # non-tangent metric
        self._nbatch_dims = len(self._batch_dims)
        assert self._nbatch_dims == 2, (
            "this instantiation covers EuclideanSampler (N, K, C, H, W)")
        self._batch_size = int(np.prod(self._batch_dims))
        self._flatten_batch_dims = (-1,) + self._data_shape[self._nbatch_dims:]
        self._normalize_dims = self._batch_dims
        self.w = w
        self.b = b

    def forward(self, x):
        # forward_impl_ (model forward + squared-logit-norm) and the MC
        # integration over K (core.metric_helpers.integrate, taken as the mean
        # over the K sampling dim) are fused into a single Pallas kernel.
        return metric_forward(x, self.w, self.b)


if __name__ == "__main__":
    # small shapes: N=2 base points, K=4 MC samples, C=4, H=W=16
    N, K, C, H, W = 2, 4, 4, 16, 16
    D = C * H * W          # 1024
    NCLASSES = 8

    key = jax.random.PRNGKey(0)
    kx, kw, kb = jax.random.split(key, 3)
    x = jax.random.normal(kx, (N, K, C, H, W), dtype=jnp.float32)
    w = jax.random.normal(kw, (D, NCLASSES), dtype=jnp.float32) * 0.02
    b = jax.random.normal(kb, (NCLASSES,), dtype=jnp.float32) * 0.1

    metric = MetricPallas(w, b, (N, K, C, H, W))
    out = jax.block_until_ready(metric.forward(x))

    # reference (plain JAX, f32) sanity check; bf16 matmul inputs -> loose tolerance
    x_flat = x.reshape(N * K, D)
    logits_ref = x_flat @ w + b
    per_sample_ref = jnp.sum(logits_ref * logits_ref, axis=-1)
    ref = per_sample_ref.reshape(N, K).mean(axis=-1)
    assert out.shape == (N,)
    np.testing.assert_allclose(np.asarray(out), np.asarray(ref), rtol=2e-2, atol=1e-3)

    print("KERNEL_OK")
</pallas_src>

<mosaic_0001>
module attributes {stable_mosaic.version = 11 : i64} {
  func.func @_metric_kernel(%arg0: i32, %arg1: memref<16x1024xbf16, #tpu.memory_space<vmem>>, %arg2: memref<1024x128xbf16, #tpu.memory_space<vmem>>, %arg3: memref<1x128xf32, #tpu.memory_space<vmem>>, %arg4: memref<4x16xf32, #tpu.memory_space<vmem>>, %arg5: memref<1x4x128xf32, #tpu.memory_space<vmem>>) attributes {dimension_semantics = [#tpu.dimension_semantics<parallel>], iteration_bounds = array<i64: 1>, scalar_prefetch = 0 : i64, scratch_operands = 0 : i64, tpu.core_type = #tpu.core_type<tc>, window_params = [{transform_indices = @transform_0, window_bounds = array<i64: 16, 1024>}, {pipeline_mode = #tpu.pipeline_mode<synchronous>, transform_indices = @transform_1, window_bounds = array<i64: 1024, 128>}, {pipeline_mode = #tpu.pipeline_mode<synchronous>, transform_indices = @transform_2, window_bounds = array<i64: 1, 128>}, {pipeline_mode = #tpu.pipeline_mode<synchronous>, transform_indices = @transform_3, window_bounds = array<i64: 4, 16>}, {transform_indices = @transform_4, window_bounds = array<i64: 1, 4, 128>}]} {
    %c0 = arith.constant 0 : index
    %c0_0 = arith.constant 0 : index
    %0 = vector.load %arg1[%c0, %c0_0] : memref<16x1024xbf16, #tpu.memory_space<vmem>>, vector<16x1024xbf16>
    %c0_1 = arith.constant 0 : index
    %c0_2 = arith.constant 0 : index
    %1 = vector.load %arg2[%c0_1, %c0_2] : memref<1024x128xbf16, #tpu.memory_space<vmem>>, vector<1024x128xbf16>
    %cst = arith.constant dense<0.000000e+00> : vector<16x128xf32>
    %2 = tpu.matmul %0, %1, %cst {dimension_numbers = #tpu.dot_dimension_numbers<[1], [0], [0], [1], [0, 0, 1, 1], [], []>} : vector<16x1024xbf16>, vector<1024x128xbf16>, vector<16x128xf32> -> vector<16x128xf32>
    %c0_3 = arith.constant 0 : index
    %c0_4 = arith.constant 0 : index
    %3 = vector.load %arg3[%c0_3, %c0_4] : memref<1x128xf32, #tpu.memory_space<vmem>>, vector<1x128xf32>
    %4 = vector.broadcast %3 : vector<1x128xf32> to vector<16x128xf32>
    %5 = arith.addf %2, %4 : vector<16x128xf32>
    %6 = arith.mulf %5, %5 : vector<16x128xf32>
    %cst_5 = arith.constant dense<0.000000e+00> : vector<16xf32>
    %7 = vector.multi_reduction <add>, %6, %cst_5 [1] : vector<16x128xf32> to vector<16xf32>
    %8 = vector.shape_cast %7 : vector<16xf32> to vector<16x1xf32>
    %c0_6 = arith.constant 0 : index
    %c0_7 = arith.constant 0 : index
    %9 = vector.load %arg4[%c0_6, %c0_7] : memref<4x16xf32, #tpu.memory_space<vmem>>, vector<4x16xf32>
    %cst_8 = arith.constant dense<0.000000e+00> : vector<4x1xf32>
    %10 = tpu.matmul %9, %8, %cst_8 {dimension_numbers = #tpu.dot_dimension_numbers<[1], [0], [0], [1], [0, 0, 1, 1], [], []>} : vector<4x16xf32>, vector<16x1xf32>, vector<4x1xf32> -> vector<4x1xf32>
    %11 = vector.shape_cast %10 : vector<4x1xf32> to vector<1x4x1xf32>
    %12 = vector.shape_cast %11 : vector<1x4x1xf32> to vector<1x4x1xf32>
    %13 = vector.broadcast %12 : vector<1x4x1xf32> to vector<1x4x128xf32>
    %c0_9 = arith.constant 0 : index
    %c0_10 = arith.constant 0 : index
    %c0_11 = arith.constant 0 : index
    %14 = vector.load %arg5[%c0_9, %c0_10, %c0_11] : memref<1x4x128xf32, #tpu.memory_space<vmem>>, vector<1x4x128xf32>
    tpu.vector_store %arg5[%c0_9, %c0_10, %c0_11], %13 {strides = array<i32>} : memref<1x4x128xf32, #tpu.memory_space<vmem>>, vector<1x4x128xf32>,
    return
  }
  func.func @transform_0(%arg0: i32) -> (i32, i32) {
    %c0_i32 = arith.constant 0 : i32
    %c0_i32_0 = arith.constant 0 : i32
    return %arg0, %c0_i32 : i32, i32
  }
  func.func @transform_1(%arg0: i32) -> (i32, i32) {
    %c0_i32 = arith.constant 0 : i32
    %c0_i32_0 = arith.constant 0 : i32
    %c0_i32_1 = arith.constant 0 : i32
    return %c0_i32, %c0_i32_0 : i32, i32
  }
  func.func @transform_2(%arg0: i32) -> (i32, i32) {
    %c0_i32 = arith.constant 0 : i32
    %c0_i32_0 = arith.constant 0 : i32
    %c0_i32_1 = arith.constant 0 : i32
    return %c0_i32, %c0_i32_0 : i32, i32
  }
  func.func @transform_3(%arg0: i32) -> (i32, i32) {
    %c0_i32 = arith.constant 0 : i32
    %c0_i32_0 = arith.constant 0 : i32
    %c0_i32_1 = arith.constant 0 : i32
    return %c0_i32, %c0_i32_0 : i32, i32
  }
  func.func @transform_4(%arg0: i32) -> (i32, i32, i32) {
    %c0_i32 = arith.constant 0 : i32
    %c0_i32_0 = arith.constant 0 : i32
    %c0_i32_1 = arith.constant 0 : i32
    return %arg0, %c0_i32, %c0_i32_0 : i32, i32, i32
  }
}

</mosaic_0001>

<bundles_post_ra>
// kernel: tpu_custom_call.1
= control target key start
LH: loop header
LB: loop body
LE: loop exit
PB: predicated region body
PF: predicated region fallthrough
CT: control target
= control target key end

     0   :  { %9 = vsyncpa [#allocation3], 0  ;;  %s1318_s0 = inlined_call_operand.hbm [shape: bf16[16,1024], index: 0, kind: input, shape index: {}]   ;;  %s1319_s1 = inlined_call_operand.hbm [shape: bf16[1024,128], index: 1, kind: input, shape index: {}]   ;;  %s1320_s2 = inlined_call_operand.vmem [shape: f32[1,128], index: 2, kind: input, shape index: {}]   ;;  %s1321_s3 = inlined_call_operand.hbm [shape: f32[4,16], index: 3, kind: input, shape index: {}]   ;;  %s1322_s4 = inlined_call_operand.hbm [shape: f32[1,4,128], index: 4, kind: output, shape index: {}]  }
   0x1   :  { %10 = vsyncpa [#allocation6], 0  ;;  %s29_s17 = sshll.u32 %s1319_s1, 4  ;;  %s30_s17 = int_to_ptr.hbm [resolvable:$true] %s29_s17 }
   0x2   :  { %11 = vsyncpa [#allocation4], 0  ;;  %s1269_s18 = smov [#allocation5]   ;;  %s16_s22 = sshll.u32 %s1318_s0, 4  ;;  %s17_s22 = int_to_ptr.hbm [resolvable:$true] %s16_s22 }
   0x3   :  { %s31_s19 = sshll.u32 %s1269_s18, 4  ;;  %s1270_s23 = smov 64   ;;  %s32_s19 = int_to_ptr.vmem [resolvable:$true] %s31_s19 }
   0x4   :  { %s1271_s24 = smov 4   ;;  %s1272_s25 = smov [#allocation2]  }
   0x5   :  { %37 = dma.hbm_to_vmem [thread:$0]  %s30_s17, 8192, %s32_s19, [#allocation6], %s1270_s23, %s1270_s23, %s1271_s24  }
   0x6   :  { %s18_s26 = sshll.u32 %s1272_s25, 4  ;;  %s1273_s27 = smov 512   ;;  %s19_s26 = int_to_ptr.vmem [resolvable:$true] %s18_s26 }
   0x7   :  { %s1274_s28 = smov 32   ;;  %s45_s30 = sshll.u32 %s1321_s3, 4  ;;  %s46_s30 = int_to_ptr.hbm [resolvable:$true] %s45_s30 }
   0x8   :  { %24 = dma.hbm_to_vmem [thread:$0]  %s17_s22, 1024, %s19_s26, [#allocation3], %s1273_s27, %s1273_s27, %s1274_s28  }
   0x9   :  { %s1275_s5 = smov [#allocation7]  }
   0xa   :  { %s47_s6 = sshll.u32 %s1275_s5, 4  ;;  %s48_s6 = int_to_ptr.vmem [resolvable:$true] %s47_s6 }
   0xb   :  { %50 = dma.hbm_to_vmem [thread:$0]  %s46_s30, 64, %s48_s6, [#allocation6]  }
   0xc   :  { %1263 = dma.done.wait [#allocation3], 1024  }
   0xd   :  { %1264 = vsyncadd [#allocation3], 4294966272 }
   0xe   :  { %1265 = dma.done.wait [#allocation6], 8256  }
   0xf   :  { %1266 = vsyncadd [#allocation6], 4294959040  ;;  %v1098_v0 = vld [vmem:[#allocation5 + $0x38] sm:$0xff]  ;;  %v1097_v4 = vld [vmem:[#allocation5 + $0x30] sm:$0xff]  ;;  %vm746_vm0 = vcmask 130048   ;;  %s783_s10 = sshll.u32 %s1322_s4, 4  ;;  %s784_s10 = int_to_ptr.hbm [resolvable:$true] %s783_s10 }
  0x10   :  { %v1106_v1 = vld [vmem:[#allocation5 + $0x78] sm:$0xff]  ;;  %627 = vmatpush.bf16.msra.mxu0 %v1098_v0  ;;  %v1105_v5 = vld [vmem:[#allocation5 + $0x70] sm:$0xff]  ;;  %v1096_v8 = vld [vmem:[#allocation5 + $0x28] sm:$0xff] }
  0x11   :  { %v1114_v2 = vld [vmem:[#allocation5 + $0xb8] sm:$0xff]  ;;  %641 = vmatpush.bf16.msra.mxu1 %v1106_v1  ;;  %v1113_v6 = vld [vmem:[#allocation5 + $0xb0] sm:$0xff]  ;;  %v1104_v9 = vld [vmem:[#allocation5 + $0x68] sm:$0xff] }
  0x12   :  { %v1122_v3 = vld [vmem:[#allocation5 + $0xf8] sm:$0xff]  ;;  %655 = vmatpush.bf16.msra.mxu2 %v1114_v2  ;;  %v1121_v7 = vld [vmem:[#allocation5 + $0xf0] sm:$0xff]  ;;  %v1112_v10 = vld [vmem:[#allocation5 + $0xa8] sm:$0xff] }
  0x13   :  { %669 = vmatpush.bf16.msra.mxu3 %v1122_v3  ;;  %v1120_v11 = vld [vmem:[#allocation5 + $0xe8] sm:$0xff]  ;;  %v1095_v12 = vld [vmem:[#allocation5 + $0x20] sm:$0xff]  ;;  %v1094_v16 = vld [vmem:[#allocation5 + $0x18] sm:$0xff] }
  0x14   :  { %628 = vmatpush.bf16.msra.mxu0 %v1097_v4  ;;  %v1103_v13 = vld [vmem:[#allocation5 + $0x60] sm:$0xff]  ;;  %v1102_v17 = vld [vmem:[#allocation5 + $0x58] sm:$0xff]  ;;  %v1093_v20 = vld [vmem:[#allocation5 + $0x10] sm:$0xff] }
  0x15   :  { %642 = vmatpush.bf16.msra.mxu1 %v1105_v5  ;;  %v1111_v14 = vld [vmem:[#allocation5 + $0xa0] sm:$0xff]  ;;  %v1110_v18 = vld [vmem:[#allocation5 + $0x98] sm:$0xff]  ;;  %v1101_v21 = vld [vmem:[#allocation5 + $0x50] sm:$0xff] }
  0x16   :  { %656 = vmatpush.bf16.msra.mxu2 %v1113_v6  ;;  %v1119_v15 = vld [vmem:[#allocation5 + $0xe0] sm:$0xff]  ;;  %v1118_v19 = vld [vmem:[#allocation5 + $0xd8] sm:$0xff]  ;;  %v1109_v22 = vld [vmem:[#allocation5 + $0x90] sm:$0xff] }
  0x17   :  { %670 = vmatpush.bf16.msra.mxu3 %v1121_v7  ;;  %v1117_v23 = vld [vmem:[#allocation5 + $0xd0] sm:$0xff]  ;;  %v1092_v24 = vld [vmem:[#allocation5 + $0x8] sm:$0xff]  ;;  %v1091_v28 = vld [vmem:[#allocation5] sm:$0xff] }
  0x18   :  { %629 = vmatpush.bf16.msra.mxu0 %v1096_v8  ;;  %v1100_v25 = vld [vmem:[#allocation5 + $0x48] sm:$0xff]  ;;  %v1099_v29 = vld [vmem:[#allocation5 + $0x40] sm:$0xff]  ;;  %v1130_v32 = vld [vmem:[#allocation5 + $0x138] sm:$0xff] }
  0x19   :  { %643 = vmatpush.bf16.msra.mxu1 %v1104_v9  ;;  %v1108_v26 = vld [vmem:[#allocation5 + $0x88] sm:$0xff]  ;;  %v1107_v30 = vld [vmem:[#allocation5 + $0x80] sm:$0xff]  ;;  %v1138_v33 = vld [vmem:[#allocation5 + $0x178] sm:$0xff] }
  0x1a   :  { %657 = vmatpush.bf16.msra.mxu2 %v1112_v10  ;;  %v1116_v27 = vld [vmem:[#allocation5 + $0xc8] sm:$0xff]  ;;  %v1115_v31 = vld [vmem:[#allocation5 + $0xc0] sm:$0xff]  ;;  %v1146_v42 = vld [vmem:[#allocation5 + $0x1b8] sm:$0xff] }
  0x1b   :  { %671 = vmatpush.bf16.msra.mxu3 %v1120_v11  ;;  %v804_v34 = vld [vmem:[#allocation2 + $0x8] sm:$0xf]  ;;  %v796_v36 = vld [vmem:[#allocation2] sm:$0xf]  ;;  %v1084_v38 = vld [vmem:[#allocation2 + $0xc] sm:$0xf] }
  0x1c   :  { %630 = vmatpush.bf16.msra.mxu0 %v1095_v12  ;;  %v1088_v35 = vld [vmem:[#allocation2 + $0x24] sm:$0xf0]  ;;  %v1087_v37 = vld [vmem:[#allocation2 + $0x1c] sm:$0xf0]  ;;  %v806_v39 = vld [vmem:[#allocation2 + $0x28] sm:$0xf0] }
  0x1d   :  { %644 = vmatpush.bf16.msra.mxu1 %v1103_v13  ;;  %v1083_v40 = vld [vmem:[#allocation2 + $0x4] sm:$0xf]  ;;  %v1154_v43 = vld [vmem:[#allocation5 + $0x1f8] sm:$0xff]  ;;  %v805_v44 = vor.u32 %v1088_v35, %v804_v34  ;;  %v797_v45 = vor.u32 %v1087_v37, %v796_v36  ;;  %v809_v46 = vor.u32 %v1084_v38, %v806_v39  ;;  %v1129_v48 = vld [vmem:[#allocation5 + $0x130] sm:$0xff] }
  0x1e   :  { %658 = vmatpush.bf16.msra.mxu2 %v1111_v14  ;;  %v798_v41 = vld [vmem:[#allocation2 + $0x20] sm:$0xf0]  ;;  %v1137_v49 = vld [vmem:[#allocation5 + $0x170] sm:$0xff]  ;;  %v1128_v52 = vld [vmem:[#allocation5 + $0x128] sm:$0xff] }
  0x1f   :  { %672 = vmatpush.bf16.msra.mxu3 %v1119_v15  ;;  %v801_v47 = vor.u32 %v1083_v40, %v798_v41  ;;  %v1145_v50 = vld [vmem:[#allocation5 + $0x1b0] sm:$0xff]  ;;  %v1136_v53 = vld [vmem:[#allocation5 + $0x168] sm:$0xff]  ;;  %v1127_v56 = vld [vmem:[#allocation5 + $0x120] sm:$0xff] }
  0x20   :  { %631 = vmatpush.bf16.msra.mxu0 %v1094_v16  ;;  %v1153_v51 = vld [vmem:[#allocation5 + $0x1f0] sm:$0xff]  ;;  %v1144_v54 = vld [vmem:[#allocation5 + $0x1a8] sm:$0xff]  ;;  %v1135_v57 = vld [vmem:[#allocation5 + $0x160] sm:$0xff] }
  0x21   :  { %645 = vmatpush.bf16.msra.mxu1 %v1102_v17  ;;  %v1152_v55 = vld [vmem:[#allocation5 + $0x1e8] sm:$0xff]  ;;  %v1143_v58 = vld [vmem:[#allocation5 + $0x1a0] sm:$0xff]  ;;  %v1126_v60 = vld [vmem:[#allocation5 + $0x118] sm:$0xff] }
  0x22   :  { %659 = vmatpush.bf16.msra.mxu2 %v1110_v18  ;;  %v1151_v59 = vld [vmem:[#allocation5 + $0x1e0] sm:$0xff]  ;;  %v1134_v61 = vld [vmem:[#allocation5 + $0x158] sm:$0xff]  ;;  %v1125_v0 = vld [vmem:[#allocation5 + $0x110] sm:$0xff] }
  0x23   :  { %673 = vmatpush.bf16.msra.mxu3 %v1118_v19  ;;  %v1142_v62 = vld [vmem:[#allocation5 + $0x198] sm:$0xff]  ;;  %v1133_v1 = vld [vmem:[#allocation5 + $0x150] sm:$0xff]  ;;  %v1124_v4 = vld [vmem:[#allocation5 + $0x108] sm:$0xff] }
  0x24   :  { %632 = vmatpush.bf16.msra.mxu0 %v1093_v20  ;;  %v1150_v63 = vld [vmem:[#allocation5 + $0x1d8] sm:$0xff]  ;;  %v1141_v2 = vld [vmem:[#allocation5 + $0x190] sm:$0xff]  ;;  %v1132_v5 = vld [vmem:[#allocation5 + $0x148] sm:$0xff] }
  0x25   :  { %646 = vmatpush.bf16.msra.mxu1 %v1101_v21  ;;  %v1149_v3 = vld [vmem:[#allocation5 + $0x1d0] sm:$0xff]  ;;  %v1140_v6 = vld [vmem:[#allocation5 + $0x188] sm:$0xff]  ;;  %v1123_v8 = vld [vmem:[#allocation5 + $0x100] sm:$0xff] }
  0x26   :  { %660 = vmatpush.bf16.msra.mxu2 %v1109_v22  ;;  %v1148_v7 = vld [vmem:[#allocation5 + $0x1c8] sm:$0xff]  ;;  %v1131_v9 = vld [vmem:[#allocation5 + $0x140] sm:$0xff]  ;;  %v812_v12 = vld [vmem:[#allocation2 + $0x10] sm:$0xf] }
  0x27   :  { %674 = vmatpush.bf16.msra.mxu3 %v1117_v23  ;;  %v1139_v10 = vld [vmem:[#allocation5 + $0x180] sm:$0xff]  ;;  %v1089_v13 = vld [vmem:[#allocation2 + $0x2c] sm:$0xf0]  ;;  %v1085_v14 = vld [vmem:[#allocation2 + $0x14] sm:$0xf] }
  0x28   :  { %633 = vmatpush.bf16.msra.mxu0 %v1092_v24  ;;  %v1147_v11 = vld [vmem:[#allocation5 + $0x1c0] sm:$0xff]  ;;  %v814_v15 = vld [vmem:[#allocation2 + $0x30] sm:$0xf0]  ;;  %v820_v16 = vld [vmem:[#allocation2 + $0x18] sm:$0xf]  ;;  %v813_v20 = vor.u32 %v1089_v13, %v812_v12 }
  0x29   :  { %647 = vmatpush.bf16.msra.mxu1 %v1100_v25  ;;  %v1090_v17 = vld [vmem:[#allocation2 + $0x34] sm:$0xf0]  ;;  %v1086_v18 = vld [vmem:[#allocation2 + $0x1c] sm:$0xf]  ;;  %v817_v21 = vor.u32 %v1085_v14, %v814_v15 }
  0x2a   :  { %661 = vmatpush.bf16.msra.mxu2 %v1108_v26  ;;  %v822_v19 = vld [vmem:[#allocation2 + $0x38] sm:$0xf0]  ;;  %v821_v22 = vor.u32 %v1090_v17, %v820_v16 }
  0x2b   :  { %675 = vmatpush.bf16.msra.mxu3 %v1116_v27  ;;  %v825_v23 = vor.u32 %v1086_v18, %v822_v19 }
  0x2c   :  { %634 = vmatpush.bf16.msra.mxu0 %v1091_v28  ;;  %v1166_v28 = vld [vmem:[%s1320_s2] ss:$0 sm:$0xff]  ;;  %s1277_s2 = smov [#allocation8]  }
  0x2d   :  { %648 = vmatpush.bf16.msra.mxu1 %v1099_v29  ;;  %s781_s7 = sshll.u32 %s1277_s2, 4  ;;  %s782_s7 = int_to_ptr.vmem [resolvable:$true] %s781_s7 }
  0x2e   :  { %662 = vmatpush.bf16.msra.mxu2 %v1107_v30 }
  0x2f   :  { %676 = vmatpush.bf16.msra.mxu3 %v1115_v31  ;;  %635 = vmatmul.bf16.vlgmr.msra.gmra.mxu0 %v797_v45 }
  0x30   :  { %683 = vmatpush.bf16.msrb.mxu0 %v1130_v32  ;;  %649 = vmatmul.bf16.vlgmr.msra.gmra.mxu1 %v801_v47 }
  0x31   :  { %697 = vmatpush.bf16.msrb.mxu1 %v1138_v33  ;;  %663 = vmatmul.bf16.vlgmr.msra.gmra.mxu2 %v805_v44 }
  0x32   :  { %711 = vmatpush.bf16.msrb.mxu2 %v1146_v42  ;;  %677 = vmatmul.bf16.vlgmr.msra.gmra.mxu3 %v809_v46 }
  0x33   :  { %725 = vmatpush.bf16.msrb.mxu3 %v1154_v43 }
  0x34   :  { %684 = vmatpush.bf16.msrb.mxu0 %v1129_v48 }
  0x35   :  { %698 = vmatpush.bf16.msrb.mxu1 %v1137_v49 }
  0x36   :  { %712 = vmatpush.bf16.msrb.mxu2 %v1145_v50 }
  0x37   :  { %726 = vmatpush.bf16.msrb.mxu3 %v1153_v51 }
  0x38   :  { %685 = vmatpush.bf16.msrb.mxu0 %v1128_v52 }
  0x39   :  { %699 = vmatpush.bf16.msrb.mxu1 %v1136_v53 }
  0x3a   :  { %713 = vmatpush.bf16.msrb.mxu2 %v1144_v54 }
  0x3b   :  { %727 = vmatpush.bf16.msrb.mxu3 %v1152_v55 }
  0x3c   :  { %686 = vmatpush.bf16.msrb.mxu0 %v1127_v56 }
  0x3d   :  { %700 = vmatpush.bf16.msrb.mxu1 %v1135_v57 }
  0x3e   :  { %714 = vmatpush.bf16.msrb.mxu2 %v1143_v58 }
  0x3f   :  { %728 = vmatpush.bf16.msrb.mxu3 %v1151_v59  ;;  %v1276_v59 = vmov 0  }
  0x40   :  { %687 = vmatpush.bf16.msrb.mxu0 %v1126_v60  ;;  %1164 = vset.pattern.permute.xlu1 %v1276_v59 }
  0x41   :  { %701 = vmatpush.bf16.msrb.mxu1 %v1134_v61  ;;  %1165 = vset.pattern.permute.xlu0 %v1276_v59  ;;  %v745_v61 = vld [vmem:[#allocation7] sm:$0xf] }
  0x42   :  { %715 = vmatpush.bf16.msrb.mxu2 %v1142_v62 }
  0x43   :  { %729 = vmatpush.bf16.msrb.mxu3 %v1150_v63 }
  0x44   :  { %688 = vmatpush.bf16.msrb.mxu0 %v1125_v0 }
  0x45   :  { %702 = vmatpush.bf16.msrb.mxu1 %v1133_v1 }
  0x46   :  { %716 = vmatpush.bf16.msrb.mxu2 %v1141_v2 }
  0x47   :  { %730 = vmatpush.bf16.msrb.mxu3 %v1149_v3 }
  0x48   :  { %689 = vmatpush.bf16.msrb.mxu0 %v1124_v4 }
  0x49   :  { %703 = vmatpush.bf16.msrb.mxu1 %v1132_v5 }
  0x4a   :  { %717 = vmatpush.bf16.msrb.mxu2 %v1140_v6 }
  0x4b   :  { %731 = vmatpush.bf16.msrb.mxu3 %v1148_v7 }
  0x4c   :  { %690 = vmatpush.bf16.msrb.mxu0 %v1123_v8 }
  0x4d   :  { %704 = vmatpush.bf16.msrb.mxu1 %v1131_v9 }
  0x4e   :  { %718 = vmatpush.bf16.msrb.mxu2 %v1139_v10 }
  0x4f   :  { %732 = vmatpush.bf16.msrb.mxu3 %v1147_v11  ;;  %691 = vmatmul.bf16.vlgmr.msrb.gmra.mxu0 %v813_v20 }
  0x50   :  { %705 = vmatmul.bf16.vlgmr.msrb.gmra.mxu1 %v817_v21 }
  0x51   :  { %719 = vmatmul.bf16.vlgmr.msrb.gmra.mxu2 %v821_v22 }
  0x52   :  { %733 = vmatmul.bf16.vlgmr.msrb.gmra.mxu3 %v825_v23 }
  0xac   :  { %v636_v24 = vpop.f32.mrf.mxu0 }
  0xad   :  { %v650_v25 = vpop.f32.mrf.mxu1  ;;  %v637_v34 = vadd.f32 %v1166_v28, %v636_v24 }
  0xaf   :  { %v651_v38 = vadd.f32 %v650_v25, %v637_v34 }
  0xb4   :  { %v664_v26 = vpop.f32.mrf.mxu2  ;;  %v638_v29 = vpop.f32.mrf.mxu0 }
  0xb5   :  { %v678_v27 = vpop.f32.mrf.mxu3  ;;  %v652_v30 = vpop.f32.mrf.mxu1  ;;  %v639_v31 = vadd.f32 %v1166_v28, %v638_v29  ;;  %v665_v42 = vadd.f32 %v664_v26, %v651_v38 }
  0xb7   :  { %v653_v35 = vadd.f32 %v652_v30, %v639_v31  ;;  %v679_v46 = vadd.f32 %v678_v27, %v665_v42 }
  0xbc   :  { %v666_v32 = vpop.f32.mrf.mxu2 }
  0xbd   :  { %v680_v33 = vpop.f32.mrf.mxu3  ;;  %v667_v39 = vadd.f32 %v666_v32, %v653_v35 }
  0xbf   :  { %v681_v43 = vadd.f32 %v680_v33, %v667_v39 }
  0xcc   :  { %v692_v36 = vpop.f32.mrf.mxu0 }
  0xcd   :  { %v706_v37 = vpop.f32.mrf.mxu1  ;;  %v693_v48 = vadd.f32 %v692_v36, %v679_v46 }
  0xcf   :  { %v707_v53 = vadd.f32 %v706_v37, %v693_v48 }
  0xd4   :  { %v720_v40 = vpop.f32.mrf.mxu2  ;;  %v694_v44 = vpop.f32.mrf.mxu0 }
  0xd5   :  { %v734_v41 = vpop.f32.mrf.mxu3  ;;  %v695_v45 = vadd.f32 %v694_v44, %v681_v43  ;;  %v708_v47 = vpop.f32.mrf.mxu1  ;;  %v721_v55 = vadd.f32 %v720_v40, %v707_v53 }
  0xd7   :  { %v709_v49 = vadd.f32 %v708_v47, %v695_v45  ;;  %v735_v57 = vadd.f32 %v734_v41, %v721_v55 }
  0xd9   :  { %v739_v58 = vmul.f32 %v735_v57, %v735_v57 }
  0xdc   :  { %v722_v50 = vpop.f32.mrf.mxu2 }
  0xdd   :  { %v723_v51 = vadd.f32 %v722_v50, %v709_v49  ;;  %v736_v52 = vpop.f32.mrf.mxu3 }
  0xdf   :  { %v737_v54 = vadd.f32 %v736_v52, %v723_v51 }
  0xe1   :  { %v740_v56 = vmul.f32 %v737_v54, %v737_v54 }
  0xe3   :  { %743 = vadd.xlane.f32.xlu0 %v740_v56 }
  0xeb   :  { %741 = vadd.xlane.f32.xlu0 %v739_v58 }
 0x156   :  { %v744_v60 = vpop.xlane.xlu0 %743 }
 0x157   :  { %764 = vmatpush.msra.mxu0 %v744_v60 }
 0x15e   :  { %v742_v62 = vpop.xlane.xlu0 %741 }
 0x15f   :  { %765 = vmatpush.msra.mxu0 %v742_v62 }
 0x160   :  { %1082 = vmatmul.msk.f32.vlgmr.msra.gmra.mxu0 %vm746_vm0, %v745_v61 }
 0x1dd   :  { %v767_v63 = vpop.f32.mrf.mxu0 }
 0x1de   :  { %772 = vperm.xlu1 %1164, %v767_v63  }
 0x250   :  { %v773_v0 = vpop.permute.xlu1 %772 }
 0x251   :  { %775 = vst [vmem:[#allocation8] sm:$0xf] %v773_v0 }
 0x252   :  { %786 = dma.vmem_to_hbm [thread:$0]  %s782_s7, 64, %s784_s10, [#allocation4]  }
 0x253   :  { %1267 = dma.done.wait [#allocation4], 64  }
 0x254   :  { %1268 = vsyncadd [#allocation4], 4294967232 }
 0x255   :  { %791 = vsyncpa [#allocation3], 1 }
 0x256   :  { %792 = vsyncpa [#allocation6], 1 }
 0x257   :  { %793 = vsyncpa [#allocation4], 1 }

</bundles_post_ra>
